<compile_context>
chip_gen: v6e
topology: v6e:2x2x1
jax: 0.10.0
libtpu: 0.0.40
codegen_flags: <defaults>
</compile_context>

<pallas_src>
import math

import jax
import jax.numpy as jnp
from jax.experimental import pallas as pl
from jax.experimental.pallas import tpu as pltpu


# --------------------------------------------------------------------------- #
# GammaEncoding tail: Linear(c, c) + per-channel PReLU on the sinusoidal code  #
# --------------------------------------------------------------------------- #
def gamma_emb_kernel(enc_ref, wl_ref, bl_ref, alpha_ref, out_ref):
    # enc_ref:   (N, c)  [sin || cos] sinusoidal encoding
    # wl_ref:    (c, c)  Linear weight, pre-transposed to (in, out)
    # bl_ref:    (1, c)  Linear bias
    # alpha_ref: (1, c)  PReLU slopes of the embedding act
    # out_ref:   (N, c)
    y = jnp.dot(enc_ref[...], wl_ref[...], preferred_element_type=jnp.float32)
    y = y + bl_ref[...]
    out_ref[...] = jnp.where(y > 0.0, y, alpha_ref[...] * y).astype(out_ref.dtype)


# --------------------------------------------------------------------------- #
# Fused 3x3 dilated conv * beta + skip, PReLU, + time embedding                #
# --------------------------------------------------------------------------- #
def resconvemb_kernel(xt_ref, w_ref, b_ref, beta_ref, alpha_ref, emb_ref, out_ref):
    # xt_ref:    (1, 1, th+2d, W+2d, c)  zero-padded NHWC row tile (with halo)
    # w_ref:     (3, 3, c, c)            conv weight as (kh, kw, c_in, c_out)
    # b_ref:     (1, c)                  conv bias
    # beta_ref:  (1, c)                  beta
    # alpha_ref: (1, c)                  PReLU slopes
    # emb_ref:   (1, 1, c)               time-embedding row of this sample
    # out_ref:   (1, th, W, c)
    _, th, W, c = out_ref.shape
    thp = xt_ref.shape[2]
    d = (thp - th) // 2                      # dilation == padding

    xt = xt_ref[0, 0]                        # (th+2d, W+2d, c)

    acc = jnp.zeros((th * W, c), jnp.float32)
    center = None
    for ky in range(3):                      # 9 taps; each shifted view built once
        for kx in range(3):
            view = xt[ky * d:ky * d + th, kx * d:kx * d + W, :].reshape(th * W, c)
            if ky == 1 and kx == 1:
                center = view                # == unpadded x tile (the residual)
            acc = acc + jnp.dot(view, w_ref[ky, kx],
                                preferred_element_type=jnp.float32)

    conv = acc + b_ref[...]                  # (th*W, c) + (1, c)
    z = conv * beta_ref[...] + center
    y = jnp.where(z > 0.0, z, alpha_ref[...] * z) + emb_ref[0]
    out_ref[0] = y.reshape(th, W, c).astype(out_ref.dtype)


# --------------------------------------------------------------------------- #
# Wrapper                                                                      #
# --------------------------------------------------------------------------- #
def _pick_tile_rows(H, max_rows=64):
    if H <= max_rows:
        return H
    for th in range(max_rows, 7, -1):
        if H % th == 0 and th % 8 == 0:
            return th
    return H


def resconvemb_forward(x, t, params, *, dilation=1, tile_rows=None):
    """Pallas forward of ResConvEmb_: returns (y, t), like the PyTorch module."""
    N, c, H, W = x.shape
    d = dilation

    # ---- GammaEncoding -----------------------------------------------------
    # TODO(synk): the sin/cos sinusoidal table is computed in plain-JAX glue
    # (tiny (N, c) tensor); the Linear + PReLU run in a small Pallas kernel.
    count = c // 2
    step = jnp.arange(count, dtype=jnp.float32) / count
    freqs = jnp.exp(math.log(10000.0) * step)                     # (c//2,)
    enc = t.astype(jnp.float32)[:, None] * freqs[None, :]
    enc = jnp.concatenate([jnp.sin(enc), jnp.cos(enc)], axis=-1)  # (N, c)

    emb = pl.pallas_call(
        gamma_emb_kernel,
        out_shape=jax.ShapeDtypeStruct((N, c), jnp.float32),
        in_specs=[pl.BlockSpec(memory_space=pltpu.MemorySpace.VMEM)] * 4,
        out_specs=pl.BlockSpec(memory_space=pltpu.MemorySpace.VMEM),
    )(enc, params["w_lin"].T, params["b_lin"].reshape(1, c),
      params["alpha_emb"].reshape(1, c))
    emb3 = emb.reshape(N, 1, c)

    # ---- fused conv kernel ---------------------------------------------------
    th = tile_rows if tile_rows is not None else _pick_tile_rows(H)
    assert H % th == 0 and (th % 8 == 0 or th == H), (H, th)
    nT = H // th
    thp, Wp = th + 2 * d, W + 2 * d

    x_nhwc = jnp.transpose(x, (0, 2, 3, 1))                       # (N, H, W, c)
    x_pad = jnp.pad(x_nhwc, ((0, 0), (d, d), (d, d), (0, 0)))     # (N, H+2d, W+2d, c)
    # Overlapping row tiles with a 2d halo -> every pallas block is plain Blocked.
    x_tiles = jnp.stack([x_pad[:, i * th:i * th + thp] for i in range(nT)],
                        axis=1)                                   # (N, nT, thp, Wp, c)

    w_taps = jnp.transpose(params["w"], (2, 3, 1, 0))             # (3, 3, c_in, c_out)
    b2 = params["b"].reshape(1, c)
    beta2 = params["beta"].reshape(1, c)
    alpha2 = params["alpha"].reshape(1, c)

    out_nhwc = pl.pallas_call(
        resconvemb_kernel,
        out_shape=jax.ShapeDtypeStruct((N, H, W, c), jnp.float32),
        grid_spec=pltpu.PrefetchScalarGridSpec(
            num_scalar_prefetch=0,
            grid=(N, nT),
            in_specs=[
                pl.BlockSpec((1, 1, thp, Wp, c), lambda n, i: (n, i, 0, 0, 0)),
                pl.BlockSpec((3, 3, c, c), lambda n, i: (0, 0, 0, 0)),
                pl.BlockSpec((1, c), lambda n, i: (0, 0)),
                pl.BlockSpec((1, c), lambda n, i: (0, 0)),
                pl.BlockSpec((1, c), lambda n, i: (0, 0)),
                pl.BlockSpec((1, 1, c), lambda n, i: (n, 0, 0)),
            ],
            out_specs=pl.BlockSpec((1, th, W, c), lambda n, i: (n, i, 0, 0)),
        ),
        compiler_params=pltpu.CompilerParams(
            dimension_semantics=("parallel", "parallel"),
            vmem_limit_bytes=32 * 1024 * 1024),
    )(x_tiles, w_taps, b2, beta2, alpha2, emb3)

    y = jnp.transpose(out_nhwc, (0, 3, 1, 2))                     # back to NCHW
    return y, t


# --------------------------------------------------------------------------- #
# Pure-JAX reference                                                           #
# --------------------------------------------------------------------------- #
def resconvemb_ref(x, t, params, *, dilation=1):
    N, c, H, W = x.shape
    count = c // 2
    step = jnp.arange(count, dtype=jnp.float32) / count
    freqs = jnp.exp(math.log(10000.0) * step)
    enc = t.astype(jnp.float32)[:, None] * freqs[None, :]
    enc = jnp.concatenate([jnp.sin(enc), jnp.cos(enc)], axis=-1)
    lin = enc @ params["w_lin"].T + params["b_lin"]
    emb = jnp.where(lin > 0, lin, params["alpha_emb"][None, :] * lin)

    conv = jax.lax.conv_general_dilated(
        x, params["w"], window_strides=(1, 1),
        padding=[(dilation, dilation), (dilation, dilation)],
        rhs_dilation=(dilation, dilation),
        dimension_numbers=("NCHW", "OIHW", "NCHW"))
    conv = conv + params["b"].reshape(1, c, 1, 1)
    z = conv * params["beta"] + x
    y = jnp.where(z > 0, z, params["alpha"].reshape(1, c, 1, 1) * z)
    y = y + emb[:, :, None, None]
    return y, t


if __name__ == "__main__":
    key = jax.random.PRNGKey(0)
    N, c, H, W = 2, 4, 16, 16
    ks = jax.random.split(key, 4)

    x = jax.random.normal(ks[0], (N, c, H, W), jnp.float32)
    t = jax.random.uniform(ks[1], (N,), jnp.float32)

    params = dict(
        w=jax.random.normal(ks[2], (c, c, 3, 3), jnp.float32) * 0.1,   # Conv2d weight
        b=jnp.linspace(-0.1, 0.1, c).astype(jnp.float32),              # Conv2d bias
        beta=(1.0 + jnp.linspace(-0.2, 0.2, c)).astype(jnp.float32).reshape(1, c, 1, 1),
        alpha=jnp.full((c,), 0.2, jnp.float32),                        # PReLU(c, 0.2)
        w_lin=jax.random.normal(ks[3], (c, c), jnp.float32) * 0.3,     # GammaEncoding.linear
        b_lin=jnp.linspace(-0.05, 0.05, c).astype(jnp.float32),
        alpha_emb=jnp.full((c,), 0.25, jnp.float32),                   # GammaEncoding.act
    )

    for dil in (1, 2):
        out, t_out = resconvemb_forward(x, t, params, dilation=dil, tile_rows=8)
        jax.block_until_ready(out)
        ref, _ = resconvemb_ref(x, t, params, dilation=dil)
        assert out.shape == (N, c, H, W)
        err = float(jnp.max(jnp.abs(out - ref)))
        assert jnp.allclose(out, ref, atol=1e-4, rtol=1e-4), (dil, err)

    print("KERNEL_OK")
</pallas_src>

<mosaic_0001>
module attributes {stable_mosaic.version = 11 : i64} {
  func.func @gamma_emb_kernel(%arg0: memref<2x4xf32, #tpu.memory_space<vmem>>, %arg1: memref<4x4xf32, #tpu.memory_space<vmem>>, %arg2: memref<1x4xf32, #tpu.memory_space<vmem>>, %arg3: memref<1x4xf32, #tpu.memory_space<vmem>>, %arg4: memref<2x4xf32, #tpu.memory_space<vmem>>) attributes {dimension_semantics = [], scalar_prefetch = 0 : i64, scratch_operands = 0 : i64, tpu.core_type = #tpu.core_type<tc>} {
    %c0 = arith.constant 0 : index
    %c0_0 = arith.constant 0 : index
    %0 = vector.load %arg0[%c0, %c0_0] : memref<2x4xf32, #tpu.memory_space<vmem>>, vector<2x4xf32>
    %c0_1 = arith.constant 0 : index
    %c0_2 = arith.constant 0 : index
    %1 = vector.load %arg1[%c0_1, %c0_2] : memref<4x4xf32, #tpu.memory_space<vmem>>, vector<4x4xf32>
    %cst = arith.constant dense<0.000000e+00> : vector<2x4xf32>
    %2 = tpu.matmul %0, %1, %cst {dimension_numbers = #tpu.dot_dimension_numbers<[1], [0], [0], [1], [0, 0, 1, 1], [], []>} : vector<2x4xf32>, vector<4x4xf32>, vector<2x4xf32> -> vector<2x4xf32>
    %c0_3 = arith.constant 0 : index
    %c0_4 = arith.constant 0 : index
    %3 = vector.load %arg2[%c0_3, %c0_4] : memref<1x4xf32, #tpu.memory_space<vmem>>, vector<1x4xf32>
    %4 = vector.broadcast %3 : vector<1x4xf32> to vector<2x4xf32>
    %5 = arith.addf %2, %4 : vector<2x4xf32>
    %cst_5 = arith.constant 0.000000e+00 : f32
    %6 = vector.broadcast %cst_5 : f32 to vector<2x4xf32>
    %7 = arith.cmpf ogt, %5, %6 : vector<2x4xf32>
    %c0_6 = arith.constant 0 : index
    %c0_7 = arith.constant 0 : index
    %8 = vector.load %arg3[%c0_6, %c0_7] : memref<1x4xf32, #tpu.memory_space<vmem>>, vector<1x4xf32>
    %9 = vector.broadcast %8 : vector<1x4xf32> to vector<2x4xf32>
    %10 = arith.mulf %9, %5 : vector<2x4xf32>
    %11 = arith.select %7, %5, %10 : vector<2x4xi1>, vector<2x4xf32>
    %c0_8 = arith.constant 0 : index
    %c0_9 = arith.constant 0 : index
    %12 = vector.load %arg4[%c0_8, %c0_9] : memref<2x4xf32, #tpu.memory_space<vmem>>, vector<2x4xf32>
    tpu.vector_store %arg4[%c0_8, %c0_9], %11 {strides = array<i32>} : memref<2x4xf32, #tpu.memory_space<vmem>>, vector<2x4xf32>,
    return
  }
}

</mosaic_0001>

<bundles_post_ra>
// kernel: tpu_custom_call.1
= control target key start
LH: loop header
LB: loop body
LE: loop exit
PB: predicated region body
PF: predicated region fallthrough
CT: control target
= control target key end

     0   :  { %9 = vsyncpa [#allocation3], 0  ;;  %s284_s0 = inlined_call_operand.hbm [shape: f32[2,4], index: 0, kind: input, shape index: {}]   ;;  %s285_s1 = inlined_call_operand.hbm [shape: f32[4,4], index: 1, kind: input, shape index: {}]   ;;  %s286_s2 = inlined_call_operand.vmem [shape: f32[1,4], index: 2, kind: input, shape index: {}]   ;;  %s287_s3 = inlined_call_operand.vmem [shape: f32[1,4], index: 3, kind: input, shape index: {}]   ;;  %s288_s4 = inlined_call_operand.hbm [shape: f32[2,4], index: 4, kind: output, shape index: {}]  }
   0x1   :  { %10 = vsyncpa [#allocation6], 0 }
   0x2   :  { %11 = vsyncpa [#allocation4], 0  ;;  %s239_s15 = smov [#allocation2]   ;;  %s240_s17 = smov [#allocation5]  }
   0x3   :  { %s18_s16 = sshll.u32 %s239_s15, 4  ;;  %s28_s18 = sshll.u32 %s240_s17, 4  ;;  %s19_s16 = int_to_ptr.vmem [resolvable:$true] %s18_s16  ;;  %s29_s18 = int_to_ptr.vmem [resolvable:$true] %s28_s18 }
   0x4   :  { %s181_s19 = scalar_lea.vmem %s19_s16, 32  ;;  %p186_p1 = scmp.lt.s32.totalorder %s19_s16, %s19_s16 }
   0x5   :  { %p182_p0 = scmp.ne.s32.totalorder %s19_s16, %s181_s19  ;;  %p187_p2 = scmp.lt.s32.totalorder %s181_s19, %s181_s19 }
   0x7   :  { %p188_p3 = por %p187_p2, %p186_p1 }
   0x9   :  { %p189_p4 = pnand %p188_p3, %p182_p0 }
   0xb   :  { %192 = shalt.err (!%p189_p4)
}
   0xc   :  { %21 = dma.hbm_to_vmem [thread:$0]  %s284_s0, 32, %s19_s16, [#allocation3]  }
   0xd   :  { %s201_s22 = scalar_lea.vmem %s29_s18, 64  ;;  %p206_p6 = scmp.lt.s32.totalorder %s29_s18, %s29_s18 }
   0xe   :  { %p202_p5 = scmp.ne.s32.totalorder %s29_s18, %s201_s22  ;;  %p207_p7 = scmp.lt.s32.totalorder %s201_s22, %s201_s22 }
  0x10   :  { %p208_p8 = por %p207_p7, %p206_p6 }
  0x12   :  { %p209_p9 = pnand %p208_p8, %p202_p5 }
  0x14   :  { %212 = shalt.err (!%p209_p9)
}
  0x15   :  { %31 = dma.hbm_to_vmem [thread:$0]  %s285_s1, 64, %s29_s18, [#allocation6]  }
  0x16   :  { %233 = dma.done.wait [#allocation3], 32  }
  0x17   :  { %234 = vsyncadd [#allocation3], 4294967264 }
  0x18   :  { %235 = dma.done.wait [#allocation6], 64  }
  0x19   :  { %236 = vsyncadd [#allocation6], 4294967232  ;;  %v241_v0 = vmov 0.0   ;;  %vm242_vm0 = vmmov 0   ;;  %vm55_vm1 = vcmask 1043456   ;;  %vm51_vm2 = vcmask 31744  }
  0x1a   :  { %163 = vmatprep.subr.mxu0 %v241_v0  ;;  %165 = vmatprep.mubr.msk.f32.mxu0 %vm242_vm0, %v241_v0  ;;  %v43_v1 = vld [vmem:[#allocation5] sm:$0xf]  ;;  %v42_v2 = vld [vmem:[#allocation2] sm:$0x3]  ;;  %s243_s27 = smov [#allocation7]   ;;  %vm139_vm4 = vcmask 25600  }
  0x1b   :  { %164 = vmatpush3.msk.msra.mxu0 %vm55_vm1, %v43_v1  ;;  %v157_v3 = vld [vmem:[%s286_s2] ss:$0 sm:$0xff]  ;;  %s147_s28 = sshll.u32 %s243_s27, 4  ;;  %s148_s28 = int_to_ptr.vmem [resolvable:$true] %s147_s28 }
  0x1c   :  { %166 = vmatmul.mubr.msk.f32.vlgmr.msra.gmra.mxu0 %vm51_vm2, %v42_v2  ;;  %v160_v5 = vld [vmem:[%s287_s3] ss:$0 sm:$0xff]  ;;  %s213_s29 = scalar_lea.vmem %s148_s28, 32  ;;  %p218_p11 = scmp.lt.s32.totalorder %s148_s28, %s148_s28 }
  0x1d   :  { %p214_p10 = scmp.ne.s32.totalorder %s148_s28, %s213_s29  ;;  %p219_p12 = scmp.lt.s32.totalorder %s213_s29, %s213_s29 }
  0x1f   :  { %p220_p13 = por %p219_p12, %p218_p11 }
  0x21   :  { %p221_p0 = pnand %p220_p13, %p214_p10 }
  0xdc   :  { %v125_v4 = vpop.f32.mrf.mxu0 }
  0xdd   :  { %v126_v6 = vadd.f32 %v157_v3, %v125_v4 }
  0xde   :  { %v167_v7 = vpop.f32.mrf.mxu0 }
  0xdf   :  { %vm129_vm3 = vcmp.gt.f32.partialorder %v126_v6, 0.0  ;;  %v137_v8 = vmul.f32 %v160_v5, %v126_v6 }
  0xe1   :  { %v138_v9 = vsel %vm129_vm3, %v126_v6, %v137_v8 }
  0xe2   :  { %140 = vst.msk [vmem:[#allocation7] sm:$0x3] %vm139_vm4, %v138_v9 }
  0xe3   :  { %224 = shalt.err (!%p221_p0)
}
  0xe4   :  { %150 = dma.vmem_to_hbm [thread:$0]  %s148_s28, 32, %s288_s4, [#allocation4]  }
  0xe5   :  { %237 = dma.done.wait [#allocation4], 32  }
  0xe6   :  { %238 = vsyncadd [#allocation4], 4294967264 }
  0xe7   :  { %154 = vsyncpa [#allocation3], 1 }
  0xe8   :  { %155 = vsyncpa [#allocation6], 1 }
  0xe9   :  { %156 = vsyncpa [#allocation4], 1 }

</bundles_post_ra>
